<compile_context>
chip_gen: v6e
topology: v6e:2x2x1
jax: 0.10.0
libtpu: 0.0.40
codegen_flags: <defaults>
</compile_context>

<pallas_src>
import functools

import jax
import jax.numpy as jnp
from jax import lax
from jax.experimental import pallas as pl
from jax.experimental.pallas import tpu as pltpu

_LANE = 128
_SUBLANE = 8
# Explicit scoped-VMEM limit: fits v7x's 64 MiB physical VMEM with headroom and
# is far above the 16 / 32 MiB scoped defaults on v5e / v6e / v7x.
_VMEM_LIMIT_BYTES = 48 * 1024 * 1024
_VMEM_SLACK_BYTES = 8 * 1024 * 1024
_MAX_SINGLE_K_LANES = 8192          # widest padded row kept as one K block
_SPLIT_TILE_K = 1024                # K chunk when splitting very wide D

# Module-level switch: if 3-deep input buffering is rejected by this Pallas
# build, fall back to default double-buffering once and remember.
_TRY_DEEPER_X_PIPELINE = [True]


def _round_up(x, m):
    return ((x + m - 1) // m) * m


def _linreg_kernel(x_ref, w_ref, b_ref, o_ref):
    """One (tile_n, tile_k) tile of X against the matching (1, tile_k) w slice."""
    k = pl.program_id(1)

    @pl.when(k == 0)
    def _init():
        # Bias enters exactly once, as the accumulator's initial value.
        o_ref[...] = jnp.full(o_ref.shape, b_ref[0], dtype=o_ref.dtype)

    # (tile_n, tile_k) x (1, tile_k) -> (tile_n, 1): trans-B matvec on the MXU,
    # accumulated in f32 directly in the resident output block (its block index
    # is constant over the K axis, so it stays in VMEM across all k steps).
    o_ref[...] += lax.dot_general(
        x_ref[...],
        w_ref[...],
        dimension_numbers=(((1,), (1,)), ((), ())),
        preferred_element_type=jnp.float32,
    )


def _choose_tiles(N, D, vmem_limit_bytes):
    """Pick (tile_n, tile_k) from a lane-padding-aware VMEM byte budget."""
    lanes_full = _round_up(max(D, 1), _LANE)

    # K (feature) tiling: keep the full feature dim as one block unless a
    # padded row would be very wide; then split into 1024-lane chunks (the
    # wrapper zero-pads D so the chunks divide exactly).
    if lanes_full <= _MAX_SINGLE_K_LANES:
        tile_k = D
        k_lanes = lanes_full
    else:
        tile_k = _SPLIT_TILE_K
        k_lanes = _SPLIT_TILE_K

    # Padded per-row byte accounting (this is what actually lands in VMEM):
    #   X      : up to 3 buffers of tile_n x k_lanes f32
    #   output : 2 buffers of tile_n x 128 f32   (last dim padded to a lane)
    #   w      : 2 buffers of 8 x k_lanes f32    (sublane-padded (1, tile_k))
    x_row_bytes = k_lanes * 4
    out_rows_bytes = 2 * _LANE * 4
    w_bytes = 2 * _SUBLANE * k_lanes * 4
    n_x_buffers = 3                                   # budget for deep pipelining

    budget = max(vmem_limit_bytes - _VMEM_SLACK_BYTES - w_bytes, 1 << 20)
    tile_n = budget // (n_x_buffers * x_row_bytes + out_rows_bytes)
    tile_n = max(_SUBLANE, (tile_n // _SUBLANE) * _SUBLANE)

    if N <= tile_n:
        if N >= 64:
            # Keep >= 2 row blocks so the "parallel" row axis can be sharded
            # across v7x's two TensorCores (harmless on v5e / v6e).
            tile_n = _round_up(pl.cdiv(N, 2), _SUBLANE)
        else:
            tile_n = N                                # single full-extent block
    else:
        # Prefer an even number of row blocks for a balanced megacore split.
        nb = pl.cdiv(N, tile_n)
        if nb % 2 == 1 and nb >= 3:
            tile_n = max(_SUBLANE, _round_up(pl.cdiv(N, nb + 1), _SUBLANE))
    return tile_n, tile_k


def _x_block_spec(tile_n, tile_k, n_buffers):
    index_map = lambda i, k: (i, k)
    if n_buffers > 2:
        try:
            return pl.BlockSpec(
                (tile_n, tile_k), index_map, pipeline_mode=pl.Buffered(n_buffers)
            )
        except Exception:
            pass
    return pl.BlockSpec((tile_n, tile_k), index_map)


@functools.partial(
    jax.jit, static_argnames=("tile_n", "tile_k", "vmem_limit", "x_buffers")
)
def _linreg_call(Xdata, w_row, bias, *, tile_n, tile_k, vmem_limit, x_buffers):
    N, D = Xdata.shape                     # D already padded to a tile_k multiple
    grid = (pl.cdiv(N, tile_n), D // tile_k)

    cost = pl.CostEstimate(
        flops=2 * N * D,
        transcendentals=0,
        bytes_accessed=4 * (N * D + D + 1 + N),
    )

    return pl.pallas_call(
        _linreg_kernel,
        out_shape=jax.ShapeDtypeStruct((N, 1), jnp.float32),
        grid_spec=pltpu.PrefetchScalarGridSpec(
            num_scalar_prefetch=0,
            grid=grid,
            in_specs=[
                # Streaming X tiles: row tile i, feature tile k.
                _x_block_spec(tile_n, tile_k, x_buffers),
                # Lane-major weight row slice (tiny sublane-padded footprint).
                pl.BlockSpec((1, tile_k), lambda i, k: (0, k)),
                # Scalar bias lives in SMEM.
                pl.BlockSpec(memory_space=pltpu.SMEM),
            ],
            out_specs=pl.BlockSpec((tile_n, 1), lambda i, k: (i, 0)),
        ),
        compiler_params=pltpu.CompilerParams(
            dimension_semantics=("parallel", "arbitrary"),
            vmem_limit_bytes=vmem_limit,
        ),
        cost_estimate=cost,
    )(Xdata, w_row, bias)


def linear_regression_forward(Xdata, w, *, tile_n=None, tile_k=None):
    """Equivalent of LinearRegression.forward(Xdata, w) -> (N, 1)."""
    # TODO(synk): the PyTorch module runs in float64; TPU MXU computes in f32.
    Xdata = jnp.asarray(Xdata, jnp.float32)
    w = jnp.asarray(w, jnp.float32)
    N, D = Xdata.shape
    assert w.shape == (D + 1,)

    auto_n, auto_k = _choose_tiles(N, D, _VMEM_LIMIT_BYTES)
    tn = auto_n if tile_n is None else min(tile_n, N)
    tk = auto_k if tile_k is None else min(tile_k, D)

    # Zero-pad the feature dim so tile_k divides it exactly (zero columns
    # contribute nothing to the reduction). No-op for the common small-D case.
    w_row = w[:-1].reshape(1, D)
    Xp = Xdata
    if D % tk != 0:
        d_pad = _round_up(D, tk)
        Xp = jnp.pad(Xp, ((0, 0), (0, d_pad - D)))
        w_row = jnp.pad(w_row, ((0, 0), (0, d_pad - D)))
    d_pad = Xp.shape[1]
    bias = w[-1].reshape(1)

    n_blocks = pl.cdiv(N, tn) * (d_pad // tk)
    if n_blocks >= 3 and _TRY_DEEPER_X_PIPELINE[0]:
        try:
            return _linreg_call(
                Xp, w_row, bias,
                tile_n=tn, tile_k=tk,
                vmem_limit=_VMEM_LIMIT_BYTES, x_buffers=3,
            )
        except Exception:
            _TRY_DEEPER_X_PIPELINE[0] = False   # this build rejects Buffered(3)
    return _linreg_call(
        Xp, w_row, bias,
        tile_n=tn, tile_k=tk,
        vmem_limit=_VMEM_LIMIT_BYTES, x_buffers=2,
    )


if __name__ == "__main__":
    key = jax.random.PRNGKey(0)
    kx, kw, kx2, kw2, kx3, kw3 = jax.random.split(key, 6)

    # --- Test 1: small demo shapes matching the module (single tile) ---
    N, D = 8, 32
    Xdata = jax.random.normal(kx, (N, D), dtype=jnp.float32)
    start = jax.random.normal(kw, (D + 1,), dtype=jnp.float32)

    ypreds = linear_regression_forward(Xdata, start)
    jax.block_until_ready(ypreds)
    ref = (Xdata @ start[:-1] + start[-1])[:, None]
    assert ypreds.shape == (N, 1)
    assert jnp.allclose(ypreds, ref, atol=1e-4, rtol=1e-4)

    # --- Test 2: tiled/pipelined path (grid > 1 on both axes, partial last
    #     row block, K accumulation into the resident output block) ---
    N2, D2 = 20, 256
    X2 = jax.random.normal(kx2, (N2, D2), dtype=jnp.float32)
    w2 = jax.random.normal(kw2, (D2 + 1,), dtype=jnp.float32)

    y2 = linear_regression_forward(X2, w2, tile_n=8, tile_k=128)
    jax.block_until_ready(y2)
    ref2 = (X2 @ w2[:-1] + w2[-1])[:, None]
    assert y2.shape == (N2, 1)
    assert jnp.allclose(y2, ref2, atol=1e-4, rtol=1e-4)

    # --- Test 3: auto-tiled path exercising the >=2 row-block (megacore) rule ---
    N3, D3 = 300, 64
    X3 = jax.random.normal(kx3, (N3, D3), dtype=jnp.float32)
    w3 = jax.random.normal(kw3, (D3 + 1,), dtype=jnp.float32)

    y3 = linear_regression_forward(X3, w3)
    jax.block_until_ready(y3)
    ref3 = (X3 @ w3[:-1] + w3[-1])[:, None]
    assert y3.shape == (N3, 1)
    assert jnp.allclose(y3, ref3, atol=1e-3, rtol=1e-3)

    print("KERNEL_OK")
</pallas_src>

<mosaic_0001>
module attributes {stable_mosaic.version = 11 : i64} {
  func.func @_linreg_kernel(%arg0: i32, %arg1: i32, %arg2: memref<8x32xf32, #tpu.memory_space<vmem>>, %arg3: memref<1x32xf32, #tpu.memory_space<vmem>>, %arg4: memref<1xf32, #tpu.memory_space<smem>>, %arg5: memref<8x1xf32, #tpu.memory_space<vmem>>) attributes {dimension_semantics = [#tpu.dimension_semantics<parallel>, #tpu.dimension_semantics<arbitrary>], iteration_bounds = array<i64: 1, 1>, scalar_prefetch = 0 : i64, scratch_operands = 0 : i64, tpu.core_type = #tpu.core_type<tc>, window_params = [{transform_indices = @transform_0, window_bounds = array<i64: 8, 32>}, {transform_indices = @transform_1, window_bounds = array<i64: 1, 32>}, {transform_indices = @transform_2, window_bounds = array<i64: 1>}, {transform_indices = @transform_3, window_bounds = array<i64: 8, 1>}]} {
    %c0_i32 = arith.constant 0 : i32
    %0 = arith.cmpi eq, %arg1, %c0_i32 : i32
    %1 = arith.extui %0 : i1 to i32
    %c0_i32_0 = arith.constant 0 : i32
    %2 = arith.cmpi ne, %1, %c0_i32_0 : i32
    scf.if %2 {
      %c0_8 = arith.constant 0 : index
      %9 = memref.load %arg4[%c0_8] : memref<1xf32, #tpu.memory_space<smem>>
      %10 = vector.broadcast %9 : f32 to vector<8x1xf32>
      %c0_9 = arith.constant 0 : index
      %c0_10 = arith.constant 0 : index
      %11 = vector.load %arg5[%c0_9, %c0_10] : memref<8x1xf32, #tpu.memory_space<vmem>>, vector<8x1xf32>
      tpu.vector_store %arg5[%c0_9, %c0_10], %10 {strides = array<i32>} : memref<8x1xf32, #tpu.memory_space<vmem>>, vector<8x1xf32>,
    } else {
    }
    %c0 = arith.constant 0 : index
    %c0_1 = arith.constant 0 : index
    %3 = vector.load %arg5[%c0, %c0_1] : memref<8x1xf32, #tpu.memory_space<vmem>>, vector<8x1xf32>
    %c0_2 = arith.constant 0 : index
    %c0_3 = arith.constant 0 : index
    %4 = vector.load %arg2[%c0_2, %c0_3] : memref<8x32xf32, #tpu.memory_space<vmem>>, vector<8x32xf32>
    %c0_4 = arith.constant 0 : index
    %c0_5 = arith.constant 0 : index
    %5 = vector.load %arg3[%c0_4, %c0_5] : memref<1x32xf32, #tpu.memory_space<vmem>>, vector<1x32xf32>
    %cst = arith.constant dense<0.000000e+00> : vector<8x1xf32>
    %6 = tpu.matmul %4, %5, %cst {dimension_numbers = #tpu.dot_dimension_numbers<[1], [1], [0], [0], [0, 0, 1, 0], [], []>} : vector<8x32xf32>, vector<1x32xf32>, vector<8x1xf32> -> vector<8x1xf32>
    %7 = arith.addf %3, %6 : vector<8x1xf32>
    %c0_6 = arith.constant 0 : index
    %c0_7 = arith.constant 0 : index
    %8 = vector.load %arg5[%c0_6, %c0_7] : memref<8x1xf32, #tpu.memory_space<vmem>>, vector<8x1xf32>
    tpu.vector_store %arg5[%c0_6, %c0_7], %7 {strides = array<i32>} : memref<8x1xf32, #tpu.memory_space<vmem>>, vector<8x1xf32>,
    return
  }
  func.func @transform_0(%arg0: i32, %arg1: i32) -> (i32, i32) {
    %c0_i32 = arith.constant 0 : i32
    return %arg0, %arg1 : i32, i32
  }
  func.func @transform_1(%arg0: i32, %arg1: i32) -> (i32, i32) {
    %c0_i32 = arith.constant 0 : i32
    %c0_i32_0 = arith.constant 0 : i32
    return %c0_i32, %arg1 : i32, i32
  }
  func.func @transform_2(%arg0: i32, %arg1: i32) -> i32 {
    %c0_i32 = arith.constant 0 : i32
    %c0_i32_0 = arith.constant 0 : i32
    return %c0_i32 : i32
  }
  func.func @transform_3(%arg0: i32, %arg1: i32) -> (i32, i32) {
    %c0_i32 = arith.constant 0 : i32
    %c0_i32_0 = arith.constant 0 : i32
    return %arg0, %c0_i32 : i32, i32
  }
}

</mosaic_0001>

<bundles_post_ra>
// kernel: _linreg_call.1
= control target key start
LH: loop header
LB: loop body
LE: loop exit
PB: predicated region body
PF: predicated region fallthrough
CT: control target
= control target key end

     0   :  { %9 = vsyncpa [#allocation4], 0  ;;  %s81_s12 = smov [#allocation3]   ;;  %s120_s0 = inlined_call_operand.hbm [shape: f32[8,32], index: 0, kind: input, shape index: {}]   ;;  %s121_s1 = inlined_call_operand.vmem [shape: f32[1,32], index: 1, kind: input, shape index: {}]   ;;  %s122_s2 = inlined_call_operand.<no memory space> [shape: f32[1], index: 2, kind: input, shape index: {}]   ;;  %s123_s3 = inlined_call_operand.vmem [shape: f32[8,1], index: 3, kind: output, shape index: {}]  }
   0x1   :  { %s16_s13 = sshll.u32 %s81_s12, 4  ;;  %s17_s13 = int_to_ptr.vmem [resolvable:$true] %s16_s13 }
   0x2   :  { %s67_s14 = scalar_lea.vmem %s17_s13, 128  ;;  %p72_p1 = scmp.lt.s32.totalorder %s17_s13, %s17_s13 }
   0x3   :  { %p68_p0 = scmp.ne.s32.totalorder %s17_s13, %s67_s14  ;;  %p73_p2 = scmp.lt.s32.totalorder %s67_s14, %s67_s14 }
   0x5   :  { %p74_p3 = por %p73_p2, %p72_p1 }
   0x7   :  { %p75_p4 = pnand %p74_p3, %p68_p0 }
   0x9   :  { %78 = shalt.err (!%p75_p4)
}
   0xa   :  { %19 = dma.hbm_to_vmem [thread:$0]  %s120_s0, 128, %s17_s13, [#allocation4]  }
   0xb   :  { %79 = dma.done.wait [#allocation4], 128  }
   0xc   :  { %80 = vsyncadd [#allocation4], 4294967168  ;;  %v32_v0 = vstv %s122_s2  ;;  %vm33_vm0 = vcmask 7168   ;;  %v36_v1 = vld [vmem:[#allocation3] sm:$0xff]  ;;  %vm45_vm1 = vcmask 261120  }
   0xd   :  { %34 = vst.msk [vmem:[%s123_s3] sm:$0xff] %vm33_vm0, %v32_v0  ;;  %v57_v2 = vld [vmem:[%s121_s1] ss:$0 sm:$0xff] }
   0xe   :  { %v44_v3 = vmul.f32 %v57_v2, %v36_v1 }
  0x10   :  { %v46_v4 = vsel %vm45_vm1, %v44_v3, 0.0 }
  0x11   :  { %47 = vadd.xlane.f32.xlu0 %v46_v4 }
  0x14   :  { %v35_v5 = vld [vmem:[%s123_s3] sm:$0xff] }
  0x9a   :  { %v48_v6 = vpop.xlane.xlu0 %47 }
  0x9b   :  { %v49_v7 = vadd.f32 %v48_v6, %v35_v5 }
  0x9d   :  { %51 = vst.msk [vmem:[%s123_s3] sm:$0xff] %vm33_vm0, %v49_v7 }
  0x9e   :  { %56 = vsyncpa [#allocation4], 1 }

</bundles_post_ra>
